<compile_context>
chip_gen: v5e
topology: v5e:2x2
jax: 0.10.0
libtpu: 0.0.40
codegen_flags: <defaults>
</compile_context>

<pallas_src>
import math
import functools

import jax
import jax.numpy as jnp
from jax.experimental import pallas as pl
from jax.experimental.pallas import tpu as pltpu


_MASK_VALUE = -1e30  # large finite negative; exp() underflows to exactly 0


@functools.lru_cache(maxsize=1)
def _vmem_limit_bytes():
    """Generation-aware VMEM cap: ~48 MiB on v7x (64 MiB phys), ~96 MiB on v5e/v6e."""
    try:
        cap = int(pltpu.get_tpu_info().vmem_capacity_bytes)
    except Exception:
        cap = 64 * 1024 * 1024  # conservative fallback
    return max(32 * 1024 * 1024, min((cap * 3) // 4, 100 * 1024 * 1024))


def _compiler_params(semantics):
    return pltpu.CompilerParams(dimension_semantics=semantics,
                                vmem_limit_bytes=_vmem_limit_bytes())


def _round_up(x, m):
    return (x + m - 1) // m * m


def _layernorm(x, w, b, eps=1e-5):
    # x: (S, D) f32 ; w, b: (1, D) f32 — LayerNorm math stays in f32.
    mu = jnp.mean(x, axis=-1, keepdims=True)
    var = jnp.mean((x - mu) ** 2, axis=-1, keepdims=True)
    return (x - mu) * jax.lax.rsqrt(var + eps) * w + b


# ----------------------------------------------------------------------------
# Kernels
# ----------------------------------------------------------------------------

def encoder_layer_kernel(x_ref,
                         wq_ref, wk_ref, wv_ref, bq_ref, bk_ref, bv_ref,
                         wo_ref, bo_ref,
                         l1w_ref, l1b_ref, l2w_ref, l2b_ref,
                         ln1w_ref, ln1b_ref, ln2w_ref, ln2b_ref,
                         o_ref, *, nhead, scale):
    """One fully fused post-norm encoder layer for one batch element.

    Everything (QKV, all-head attention, out-proj, FFN, both LayerNorms) stays
    in VMEM/vregs for the tile; the only HBM traffic is the residual stream
    plus the (single-copy) layer weights.
    """
    H = nhead
    x = x_ref[0]                                   # (S, D) f32 residual path
    S, D = x.shape

    # Head-batched projections: all heads in one batched MXU matmul each
    # (leading batch dim; no lane-axis reshapes, transposes or per-head steps).
    xh = jnp.broadcast_to(x.astype(jnp.bfloat16), (H, S, D))
    q = jnp.einsum('hsd,hde->hse', xh, wq_ref[...],
                   preferred_element_type=jnp.float32) + bq_ref[...]
    k = jnp.einsum('hsd,hde->hse', xh, wk_ref[...],
                   preferred_element_type=jnp.float32) + bk_ref[...]
    v = jnp.einsum('hsd,hde->hse', xh, wv_ref[...],
                   preferred_element_type=jnp.float32) + bv_ref[...]

    # Scores for all heads at once; f32 accumulation on the MXU.
    s = jnp.einsum('hqe,hke->hqk',
                   q.astype(jnp.bfloat16), k.astype(jnp.bfloat16),
                   preferred_element_type=jnp.float32) * jnp.float32(scale)

    # Causal mask generated in-kernel (no dense (S, S) mask through HBM/VMEM).
    row = jax.lax.broadcasted_iota(jnp.int32, (H, S, S), 1)
    col = jax.lax.broadcasted_iota(jnp.int32, (H, S, S), 2)
    s = jnp.where(col <= row, s, _MASK_VALUE)

    # Softmax in f32; reciprocal runs on the EUP slot instead of a VPU divide.
    m = jnp.max(s, axis=-1, keepdims=True)
    p = jnp.exp(s - m)
    denom = jnp.sum(p, axis=-1, keepdims=True)
    p = p * pl.reciprocal(denom, approx=True)

    ctx = jnp.einsum('hqk,hkd->hqd',
                     p.astype(jnp.bfloat16), v.astype(jnp.bfloat16),
                     preferred_element_type=jnp.float32)            # (H, S, Dh)

    # Output projection: per-head batched matmul, reduced over heads —
    # equivalent to concat(heads) @ Wo without any in-kernel concat/reshape.
    attn = jnp.einsum('hsd,hde->hse', ctx.astype(jnp.bfloat16), wo_ref[...],
                      preferred_element_type=jnp.float32)
    attn = jnp.sum(attn, axis=0) + bo_ref[...]                      # (S, D)

    x1 = _layernorm(x + attn, ln1w_ref[...], ln1b_ref[...])

    h1 = jnp.dot(x1.astype(jnp.bfloat16), l1w_ref[...],
                 preferred_element_type=jnp.float32) + l1b_ref[...]
    h1 = jnp.maximum(h1, 0.0)
    ff = jnp.dot(h1.astype(jnp.bfloat16), l2w_ref[...],
                 preferred_element_type=jnp.float32) + l2b_ref[...]

    o_ref[0] = _layernorm(x1 + ff, ln2w_ref[...], ln2b_ref[...])


def linear_kernel(x_ref, w_ref, b_ref, o_ref):
    # x: (tm, D) f32 ; w: (D, tn) bf16 (pre-transposed) ; b: (1, tn) ; o: (tm, tn)
    o_ref[...] = jnp.dot(x_ref[...].astype(jnp.bfloat16), w_ref[...],
                         preferred_element_type=jnp.float32) + b_ref[...]


# ----------------------------------------------------------------------------
# Wrappers (pallas_call plumbing)
# ----------------------------------------------------------------------------

def run_encoder_layer(x, p, *, nhead):
    B, S, D = x.shape
    H = nhead
    Dh = D // H
    d_hid = p["l1w"].shape[1]
    kernel = functools.partial(encoder_layer_kernel, nhead=H,
                               scale=1.0 / math.sqrt(Dh))
    wmap3 = lambda b: (0, 0, 0)
    wmap2 = lambda b: (0, 0)
    return pl.pallas_call(
        kernel,
        out_shape=jax.ShapeDtypeStruct((B, S, D), jnp.float32),
        grid=(B,),
        in_specs=[
            pl.BlockSpec((1, S, D), lambda b: (b, 0, 0)),     # x (residual stream)
            pl.BlockSpec((H, D, Dh), wmap3),                  # wq
            pl.BlockSpec((H, D, Dh), wmap3),                  # wk
            pl.BlockSpec((H, D, Dh), wmap3),                  # wv
            pl.BlockSpec((H, 1, Dh), wmap3),                  # bq
            pl.BlockSpec((H, 1, Dh), wmap3),                  # bk
            pl.BlockSpec((H, 1, Dh), wmap3),                  # bv
            pl.BlockSpec((H, Dh, D), wmap3),                  # wo
            pl.BlockSpec((1, D), wmap2),                      # bo
            pl.BlockSpec((D, d_hid), wmap2),                  # linear1 w
            pl.BlockSpec((1, d_hid), wmap2),                  # linear1 b
            pl.BlockSpec((d_hid, D), wmap2),                  # linear2 w
            pl.BlockSpec((1, D), wmap2),                      # linear2 b
            pl.BlockSpec((1, D), wmap2),                      # ln1 w
            pl.BlockSpec((1, D), wmap2),                      # ln1 b
            pl.BlockSpec((1, D), wmap2),                      # ln2 w
            pl.BlockSpec((1, D), wmap2),                      # ln2 b
        ],
        out_specs=pl.BlockSpec((1, S, D), lambda b: (b, 0, 0)),
        compiler_params=_compiler_params(("parallel",)),
    )(x, p["wq"], p["wk"], p["wv"], p["bq"], p["bk"], p["bv"],
      p["wo"], p["bo"], p["l1w"], p["l1b"], p["l2w"], p["l2b"],
      p["ln1w"], p["ln1b"], p["ln2w"], p["ln2b"])


def run_linear(x, w, b, *, tm, tn):
    M, D = x.shape
    N = w.shape[1]
    return pl.pallas_call(
        linear_kernel,
        out_shape=jax.ShapeDtypeStruct((M, N), jnp.float32),
        grid=(M // tm, N // tn),
        in_specs=[pl.BlockSpec((tm, D), lambda i, j: (i, 0)),
                  pl.BlockSpec((D, tn), lambda i, j: (0, j)),
                  pl.BlockSpec((1, tn), lambda i, j: (0, j))],
        out_specs=pl.BlockSpec((tm, tn), lambda i, j: (i, j)),
        compiler_params=_compiler_params(("parallel", "parallel")),
    )(x, w, b)


# ----------------------------------------------------------------------------
# Parameters / model glue
# ----------------------------------------------------------------------------

def make_pe(max_len, d_model):
    position = jnp.arange(max_len, dtype=jnp.float32)[:, None]
    div_term = jnp.exp(jnp.arange(0, d_model, 2, dtype=jnp.float32)
                       * (-math.log(10000.0) / d_model))
    pe = jnp.zeros((max_len, 1, d_model), jnp.float32)
    pe = pe.at[:, 0, 0::2].set(jnp.sin(position * div_term))
    pe = pe.at[:, 0, 1::2].set(jnp.cos(position * div_term))
    return pe


def init_params(key, ntoken, d_model, nhead, d_hid, nlayers, max_len=5000):
    initrange = 0.1
    D, H = d_model, nhead
    Dh = D // H
    keys = jax.random.split(key, 2 + nlayers)

    # Lane-dense padded vocab projection; 512-friendly padding for big vocabs.
    ntoken_pad = _round_up(ntoken, 512) if ntoken >= 512 else _round_up(ntoken, 128)

    lin_w = jax.random.uniform(keys[1], (ntoken, D), jnp.float32,
                               -initrange, initrange)
    lin_w_pad = jnp.zeros((D, ntoken_pad), jnp.float32).at[:, :ntoken].set(lin_w.T)

    params = {
        "embedding": jax.random.uniform(keys[0], (ntoken, D), jnp.float32,
                                        -initrange, initrange),
        "pe": make_pe(max_len, D),                               # precomputed once
        "lin_w": lin_w_pad.astype(jnp.bfloat16),                 # (D, ntoken_pad)
        "lin_b": jnp.zeros((1, ntoken_pad), jnp.float32),
        "layers": [],
    }
    scale = 0.05
    for l in range(nlayers):
        lk = jax.random.split(keys[2 + l], 6)
        # Head-major, pre-transposed (input-dim first) bf16 weights so the
        # fused kernel never transposes / reshapes on the MXU path; biases /
        # LayerNorm params stay f32.
        params["layers"].append(dict(
            wq=(scale * jax.random.normal(lk[0], (H, D, Dh), jnp.float32)).astype(jnp.bfloat16),
            wk=(scale * jax.random.normal(lk[1], (H, D, Dh), jnp.float32)).astype(jnp.bfloat16),
            wv=(scale * jax.random.normal(lk[2], (H, D, Dh), jnp.float32)).astype(jnp.bfloat16),
            bq=jnp.zeros((H, 1, Dh), jnp.float32),
            bk=jnp.zeros((H, 1, Dh), jnp.float32),
            bv=jnp.zeros((H, 1, Dh), jnp.float32),
            wo=(scale * jax.random.normal(lk[3], (H, Dh, D), jnp.float32)).astype(jnp.bfloat16),
            bo=jnp.zeros((1, D), jnp.float32),
            l1w=(scale * jax.random.normal(lk[4], (D, d_hid), jnp.float32)).astype(jnp.bfloat16),
            l1b=jnp.zeros((1, d_hid), jnp.float32),
            l2w=(scale * jax.random.normal(lk[5], (d_hid, D), jnp.float32)).astype(jnp.bfloat16),
            l2b=jnp.zeros((1, D), jnp.float32),
            ln1w=jnp.ones((1, D), jnp.float32),
            ln1b=jnp.zeros((1, D), jnp.float32),
            ln2w=jnp.ones((1, D), jnp.float32),
            ln2b=jnp.zeros((1, D), jnp.float32),
        ))
    return params


def transformer_forward(params, src, *, nhead, d_model, ntoken):
    B, S = src.shape
    D = d_model

    # Embedding gather + sqrt(D) scale + positional encoding stay in plain JAX
    # (XLA fuses them with the gather; a kernel would just add an HBM trip).
    emb = jnp.take(params["embedding"], src.astype(jnp.int32), axis=0)    # (B, S, D)
    # Faithful PyTorch-tutorial quirk: pe[:x.size(0)] indexes the BATCH dim
    # (input is batch-first) and broadcasts over the sequence dimension.
    x = emb * jnp.float32(math.sqrt(D)) + params["pe"][:B]

    # Pad the sequence to a sublane multiple; padded keys are causally masked
    # out of every real query row and padded rows are sliced off at the end.
    s_pad = _round_up(S, 8)
    if s_pad != S:
        x = jnp.pad(x, ((0, 0), (0, s_pad - S), (0, 0)))

    # One fused pallas_call per encoder layer; the only inter-kernel
    # activation is the f32 residual stream.
    # TODO(synk): for very long sequences switch to a flash-style KV-tiled
    # attention inside the fused layer (the (H,S,S) score tile grows as S^2).
    for lp in params["layers"]:
        x = run_encoder_layer(x, lp, nhead=nhead)

    x = x[:, :S, :]                                                       # drop seq padding

    # Final vocab projection, tiled lane-dense over (M, Npad).
    M = B * S
    x2 = x.reshape(M, D)
    n_pad = params["lin_w"].shape[1]
    tn = 512 if n_pad % 512 == 0 else (256 if n_pad % 256 == 0 else 128)
    tm_cap = 1024 if _vmem_limit_bytes() >= 64 * 1024 * 1024 else 512
    m_pad = _round_up(M, 8)
    if m_pad > tm_cap:
        m_pad = _round_up(M, tm_cap)
        tm = tm_cap
    else:
        tm = m_pad
    if m_pad != M:
        x2 = jnp.pad(x2, ((0, m_pad - M), (0, 0)))

    out = run_linear(x2, params["lin_w"], params["lin_b"], tm=tm, tn=tn)
    return out[:M, :ntoken].reshape(B, S, ntoken)                         # (B, S, ntoken)


# ----------------------------------------------------------------------------

if __name__ == "__main__":
    ntoken, d_model, nhead, d_hid, nlayers = 50, 32, 4, 64, 2
    B, S = 2, 8

    key = jax.random.PRNGKey(0)
    pkey, dkey = jax.random.split(key)
    params = init_params(pkey, ntoken, d_model, nhead, d_hid, nlayers)
    src = jax.random.randint(dkey, (B, S), 0, ntoken, dtype=jnp.int32)

    fwd = jax.jit(functools.partial(transformer_forward, nhead=nhead,
                                    d_model=d_model, ntoken=ntoken))
    out = jax.block_until_ready(fwd(params, src))

    assert out.shape == (B, S, ntoken), out.shape
    assert bool(jnp.all(jnp.isfinite(out)))
    print("KERNEL_OK")
</pallas_src>

<mosaic_0001>
module attributes {stable_mosaic.version = 11 : i64} {
  func.func @linear_kernel(%arg0: i32, %arg1: i32, %arg2: memref<16x32xf32, #tpu.memory_space<vmem>>, %arg3: memref<32x128xbf16, #tpu.memory_space<vmem>>, %arg4: memref<1x128xf32, #tpu.memory_space<vmem>>, %arg5: memref<16x128xf32, #tpu.memory_space<vmem>>) attributes {dimension_semantics = [#tpu.dimension_semantics<parallel>, #tpu.dimension_semantics<parallel>], iteration_bounds = array<i64: 1, 1>, scalar_prefetch = 0 : i64, scratch_operands = 0 : i64, tpu.core_type = #tpu.core_type<tc>, window_params = [{transform_indices = @transform_0, window_bounds = array<i64: 16, 32>}, {transform_indices = @transform_1, window_bounds = array<i64: 32, 128>}, {transform_indices = @transform_2, window_bounds = array<i64: 1, 128>}, {transform_indices = @transform_3, window_bounds = array<i64: 16, 128>}]} {
    %c0 = arith.constant 0 : index
    %c0_0 = arith.constant 0 : index
    %0 = vector.load %arg2[%c0, %c0_0] : memref<16x32xf32, #tpu.memory_space<vmem>>, vector<16x32xf32>
    %1 = arith.truncf %0 : vector<16x32xf32> to vector<16x32xbf16>
    %c0_1 = arith.constant 0 : index
    %c0_2 = arith.constant 0 : index
    %2 = vector.load %arg3[%c0_1, %c0_2] : memref<32x128xbf16, #tpu.memory_space<vmem>>, vector<32x128xbf16>
    %cst = arith.constant dense<0.000000e+00> : vector<16x128xf32>
    %3 = tpu.matmul %1, %2, %cst {dimension_numbers = #tpu.dot_dimension_numbers<[1], [0], [0], [1], [0, 0, 1, 1], [], []>} : vector<16x32xbf16>, vector<32x128xbf16>, vector<16x128xf32> -> vector<16x128xf32>
    %c0_3 = arith.constant 0 : index
    %c0_4 = arith.constant 0 : index
    %4 = vector.load %arg4[%c0_3, %c0_4] : memref<1x128xf32, #tpu.memory_space<vmem>>, vector<1x128xf32>
    %5 = vector.broadcast %4 : vector<1x128xf32> to vector<16x128xf32>
    %6 = arith.addf %3, %5 : vector<16x128xf32>
    %c0_5 = arith.constant 0 : index
    %c0_6 = arith.constant 0 : index
    %7 = vector.load %arg5[%c0_5, %c0_6] : memref<16x128xf32, #tpu.memory_space<vmem>>, vector<16x128xf32>
    tpu.vector_store %arg5[%c0_5, %c0_6], %6 {strides = array<i32>} : memref<16x128xf32, #tpu.memory_space<vmem>>, vector<16x128xf32>,
    return
  }
  func.func @transform_0(%arg0: i32, %arg1: i32) -> (i32, i32) {
    %c0_i32 = arith.constant 0 : i32
    %c0_i32_0 = arith.constant 0 : i32
    return %arg0, %c0_i32 : i32, i32
  }
  func.func @transform_1(%arg0: i32, %arg1: i32) -> (i32, i32) {
    %c0_i32 = arith.constant 0 : i32
    %c0_i32_0 = arith.constant 0 : i32
    return %c0_i32, %arg1 : i32, i32
  }
  func.func @transform_2(%arg0: i32, %arg1: i32) -> (i32, i32) {
    %c0_i32 = arith.constant 0 : i32
    %c0_i32_0 = arith.constant 0 : i32
    return %c0_i32, %arg1 : i32, i32
  }
  func.func @transform_3(%arg0: i32, %arg1: i32) -> (i32, i32) {
    %c0_i32 = arith.constant 0 : i32
    return %arg0, %arg1 : i32, i32
  }
}

module attributes {stable_mosaic.version = 11 : i64} {
  func.func @encoder_layer_kernel(%arg0: i32, %arg1: memref<1x8x32xf32, #tpu.memory_space<vmem>>, %arg2: memref<4x32x8xbf16, #tpu.memory_space<vmem>>, %arg3: memref<4x32x8xbf16, #tpu.memory_space<vmem>>, %arg4: memref<4x32x8xbf16, #tpu.memory_space<vmem>>, %arg5: memref<4x1x8xf32, #tpu.memory_space<vmem>>, %arg6: memref<4x1x8xf32, #tpu.memory_space<vmem>>, %arg7: memref<4x1x8xf32, #tpu.memory_space<vmem>>, %arg8: memref<4x8x32xbf16, #tpu.memory_space<vmem>>, %arg9: memref<1x32xf32, #tpu.memory_space<vmem>>, %arg10: memref<32x64xbf16, #tpu.memory_space<vmem>>, %arg11: memref<1x64xf32, #tpu.memory_space<vmem>>, %arg12: memref<64x32xbf16, #tpu.memory_space<vmem>>, %arg13: memref<1x32xf32, #tpu.memory_space<vmem>>, %arg14: memref<1x32xf32, #tpu.memory_space<vmem>>, %arg15: memref<1x32xf32, #tpu.memory_space<vmem>>, %arg16: memref<1x32xf32, #tpu.memory_space<vmem>>, %arg17: memref<1x32xf32, #tpu.memory_space<vmem>>, %arg18: memref<1x8x32xf32, #tpu.memory_space<vmem>>) attributes {dimension_semantics = [#tpu.dimension_semantics<parallel>], iteration_bounds = array<i64: 2>, scalar_prefetch = 0 : i64, scratch_operands = 0 : i64, tpu.core_type = #tpu.core_type<tc>, window_params = [{transform_indices = @transform_0, window_bounds = array<i64: 1, 8, 32>}, {pipeline_mode = #tpu.pipeline_mode<synchronous>, transform_indices = @transform_1, window_bounds = array<i64: 4, 32, 8>}, {pipeline_mode = #tpu.pipeline_mode<synchronous>, transform_indices = @transform_2, window_bounds = array<i64: 4, 32, 8>}, {pipeline_mode = #tpu.pipeline_mode<synchronous>, transform_indices = @transform_3, window_bounds = array<i64: 4, 32, 8>}, {pipeline_mode = #tpu.pipeline_mode<synchronous>, transform_indices = @transform_4, window_bounds = array<i64: 4, 1, 8>}, {pipeline_mode = #tpu.pipeline_mode<synchronous>, transform_indices = @transform_5, window_bounds = array<i64: 4, 1, 8>}, {pipeline_mode = #tpu.pipeline_mode<synchronous>, transform_indices = @transform_6, window_bounds = array<i64: 4, 1, 8>}, {pipeline_mode = #tpu.pipeline_mode<synchronous>, transform_indices = @transform_7, window_bounds = array<i64: 4, 8, 32>}, {pipeline_mode = #tpu.pipeline_mode<synchronous>, transform_indices = @transform_8, window_bounds = array<i64: 1, 32>}, {pipeline_mode = #tpu.pipeline_mode<synchronous>, transform_indices = @transform_9, window_bounds = array<i64: 32, 64>}, {pipeline_mode = #tpu.pipeline_mode<synchronous>, transform_indices = @transform_10, window_bounds = array<i64: 1, 64>}, {pipeline_mode = #tpu.pipeline_mode<synchronous>, transform_indices = @transform_11, window_bounds = array<i64: 64, 32>}, {pipeline_mode = #tpu.pipeline_mode<synchronous>, transform_indices = @transform_12, window_bounds = array<i64: 1, 32>}, {pipeline_mode = #tpu.pipeline_mode<synchronous>, transform_indices = @transform_13, window_bounds = array<i64: 1, 32>}, {pipeline_mode = #tpu.pipeline_mode<synchronous>, transform_indices = @transform_14, window_bounds = array<i64: 1, 32>}, {pipeline_mode = #tpu.pipeline_mode<synchronous>, transform_indices = @transform_15, window_bounds = array<i64: 1, 32>}, {pipeline_mode = #tpu.pipeline_mode<synchronous>, transform_indices = @transform_16, window_bounds = array<i64: 1, 32>}, {transform_indices = @transform_17, window_bounds = array<i64: 1, 8, 32>}]} {
    %c0 = arith.constant 0 : index
    %c0_0 = arith.constant 0 : index
    %c0_1 = arith.constant 0 : index
    %0 = vector.load %arg1[%c0, %c0_0, %c0_1] : memref<1x8x32xf32, #tpu.memory_space<vmem>>, vector<1x8x32xf32>
    %1 = vector.shape_cast %0 : vector<1x8x32xf32> to vector<8x32xf32>
    %2 = arith.truncf %1 : vector<8x32xf32> to vector<8x32xbf16>
    %3 = vector.shape_cast %2 : vector<8x32xbf16> to vector<1x8x32xbf16>
    %4 = vector.broadcast %3 : vector<1x8x32xbf16> to vector<4x8x32xbf16>
    %c0_2 = arith.constant 0 : index
    %c0_3 = arith.constant 0 : index
    %c0_4 = arith.constant 0 : index
    %5 = vector.load %arg2[%c0_2, %c0_3, %c0_4] : memref<4x32x8xbf16, #tpu.memory_space<vmem>>, vector<4x32x8xbf16>
    "tpu.trace_start"() <{level = 10 : i32, message = "hsd,hde->hse"}> : () -> ()
    %cst = arith.constant dense<0.000000e+00> : vector<4x8x8xf32>
    %6 = tpu.matmul %4, %5, %cst {dimension_numbers = #tpu.dot_dimension_numbers<[2], [1], [1], [2], [0, 0, 0, 1, 1, 2], [0], [0]>} : vector<4x8x32xbf16>, vector<4x32x8xbf16>, vector<4x8x8xf32> -> vector<4x8x8xf32>
    "tpu.trace_stop"() : () -> ()
    %c0_5 = arith.constant 0 : index
    %c0_6 = arith.constant 0 : index
    %c0_7 = arith.constant 0 : index
    %7 = vector.load %arg5[%c0_5, %c0_6, %c0_7] : memref<4x1x8xf32, #tpu.memory_space<vmem>>, vector<4x1x8xf32>
    %8 = vector.broadcast %7 : vector<4x1x8xf32> to vector<4x8x8xf32>
    %9 = arith.addf %6, %8 : vector<4x8x8xf32>
    %c0_8 = arith.constant 0 : index
    %c0_9 = arith.constant 0 : index
    %c0_10 = arith.constant 0 : index
    %10 = vector.load %arg3[%c0_8, %c0_9, %c0_10] : memref<4x32x8xbf16, #tpu.memory_space<vmem>>, vector<4x32x8xbf16>
    "tpu.trace_start"() <{level = 10 : i32, message = "hsd,hde->hse"}> : () -> ()
    %cst_11 = arith.constant dense<0.000000e+00> : vector<4x8x8xf32>
    %11 = tpu.matmul %4, %10, %cst_11 {dimension_numbers = #tpu.dot_dimension_numbers<[2], [1], [1], [2], [0, 0, 0, 1, 1, 2], [0], [0]>} : vector<4x8x32xbf16>, vector<4x32x8xbf16>, vector<4x8x8xf32> -> vector<4x8x8xf32>
    "tpu.trace_stop"() : () -> ()
    %c0_12 = arith.constant 0 : index
    %c0_13 = arith.constant 0 : index
    %c0_14 = arith.constant 0 : index
    %12 = vector.load %arg6[%c0_12, %c0_13, %c0_14] : memref<4x1x8xf32, #tpu.memory_space<vmem>>, vector<4x1x8xf32>
    %13 = vector.broadcast %12 : vector<4x1x8xf32> to vector<4x8x8xf32>
    %14 = arith.addf %11, %13 : vector<4x8x8xf32>
    %c0_15 = arith.constant 0 : index
    %c0_16 = arith.constant 0 : index
    %c0_17 = arith.constant 0 : index
    %15 = vector.load %arg4[%c0_15, %c0_16, %c0_17] : memref<4x32x8xbf16, #tpu.memory_space<vmem>>, vector<4x32x8xbf16>
    "tpu.trace_start"() <{level = 10 : i32, message = "hsd,hde->hse"}> : () -> ()
    %cst_18 = arith.constant dense<0.000000e+00> : vector<4x8x8xf32>
    %16 = tpu.matmul %4, %15, %cst_18 {dimension_numbers = #tpu.dot_dimension_numbers<[2], [1], [1], [2], [0, 0, 0, 1, 1, 2], [0], [0]>} : vector<4x8x32xbf16>, vector<4x32x8xbf16>, vector<4x8x8xf32> -> vector<4x8x8xf32>
    "tpu.trace_stop"() : () -> ()
    %c0_19 = arith.constant 0 : index
    %c0_20 = arith.constant 0 : index
    %c0_21 = arith.constant 0 : index
    %17 = vector.load %arg7[%c0_19, %c0_20, %c0_21] : memref<4x1x8xf32, #tpu.memory_space<vmem>>, vector<4x1x8xf32>
    %18 = vector.broadcast %17 : vector<4x1x8xf32> to vector<4x8x8xf32>
    %19 = arith.addf %16, %18 : vector<4x8x8xf32>
    %20 = arith.truncf %9 : vector<4x8x8xf32> to vector<4x8x8xbf16>
    %21 = arith.truncf %14 : vector<4x8x8xf32> to vector<4x8x8xbf16>
    "tpu.trace_start"() <{level = 10 : i32, message = "hqe,hke->hqk"}> : () -> ()
    %cst_22 = arith.constant dense<0.000000e+00> : vector<4x8x8xf32>
    %22 = tpu.matmul %20, %21, %cst_22 {dimension_numbers = #tpu.dot_dimension_numbers<[2], [2], [1], [1], [0, 0, 0, 1, 1, 1], [0], [0]>} : vector<4x8x8xbf16>, vector<4x8x8xbf16>, vector<4x8x8xf32> -> vector<4x8x8xf32>
    "tpu.trace_stop"() : () -> ()
    %cst_23 = arith.constant 0.353553385 : f32
    %23 = vector.broadcast %cst_23 : f32 to vector<4x8x8xf32>
    %24 = arith.mulf %22, %23 : vector<4x8x8xf32>
    %25 = tpu.iota {dimensions = array<i32: 1>} : vector<4x8x8xi32>
    %26 = tpu.iota {dimensions = array<i32: 2>} : vector<4x8x8xi32>
    %27 = arith.cmpi sle, %26, %25 : vector<4x8x8xi32>
    %cst_24 = arith.constant -1.000000e+30 : f32
    %28 = vector.broadcast %cst_24 : f32 to vector<4x8x8xf32>
    %29 = arith.select %27, %24, %28 : vector<4x8x8xi1>, vector<4x8x8xf32>
    %cst_25 = arith.constant dense<0xFF800000> : vector<4x8xf32>
    %30 = vector.multi_reduction <maximumf>, %29, %cst_25 [2] : vector<4x8x8xf32> to vector<4x8xf32>
    %31 = vector.shape_cast %30 : vector<4x8xf32> to vector<4x8x1xf32>
    %32 = vector.broadcast %31 : vector<4x8x1xf32> to vector<4x8x8xf32>
    %33 = arith.subf %29, %32 : vector<4x8x8xf32>
    %34 = math.exp %33 : vector<4x8x8xf32>
    %cst_26 = arith.constant dense<0.000000e+00> : vector<4x8xf32>
    %35 = vector.multi_reduction <add>, %34, %cst_26 [2] : vector<4x8x8xf32> to vector<4x8xf32>
    %36 = vector.shape_cast %35 : vector<4x8xf32> to vector<4x8x1xf32>
    %37 = tpu.reciprocal %36 {approx = true} : vector<4x8x1xf32> -> vector<4x8x1xf32>
    %38 = vector.broadcast %37 : vector<4x8x1xf32> to vector<4x8x8xf32>
    %39 = arith.mulf %34, %38 : vector<4x8x8xf32>
    %40 = arith.truncf %39 : vector<4x8x8xf32> to vector<4x8x8xbf16>
    %41 = arith.truncf %19 : vector<4x8x8xf32> to vector<4x8x8xbf16>
    "tpu.trace_start"() <{level = 10 : i32, message = "hqk,hkd->hqd"}> : () -> ()
    %cst_27 = arith.constant dense<0.000000e+00> : vector<4x8x8xf32>
    %42 = tpu.matmul %40, %41, %cst_27 {dimension_numbers = #tpu.dot_dimension_numbers<[2], [1], [1], [2], [0, 0, 0, 1, 1, 2], [0], [0]>} : vector<4x8x8xbf16>, vector<4x8x8xbf16>, vector<4x8x8xf32> -> vector<4x8x8xf32>
    "tpu.trace_stop"() : () -> ()
    %43 = arith.truncf %42 : vector<4x8x8xf32> to vector<4x8x8xbf16>
    %c0_28 = arith.constant 0 : index
    %c0_29 = arith.constant 0 : index
    %c0_30 = arith.constant 0 : index
    %44 = vector.load %arg8[%c0_28, %c0_29, %c0_30] : memref<4x8x32xbf16, #tpu.memory_space<vmem>>, vector<4x8x32xbf16>
    "tpu.trace_start"() <{level = 10 : i32, message = "hsd,hde->hse"}> : () -> ()
    %cst_31 = arith.constant dense<0.000000e+00> : vector<4x8x32xf32>
    %45 = tpu.matmul %43, %44, %cst_31 {dimension_numbers = #tpu.dot_dimension_numbers<[2], [1], [1], [2], [0, 0, 0, 1, 1, 2], [0], [0]>} : vector<4x8x8xbf16>, vector<4x8x32xbf16>, vector<4x8x32xf32> -> vector<4x8x32xf32>
    "tpu.trace_stop"() : () -> ()
    %cst_32 = arith.constant dense<0.000000e+00> : vector<8x32xf32>
    %46 = vector.multi_reduction <add>, %45, %cst_32 [0] : vector<4x8x32xf32> to vector<8x32xf32>
    %c0_33 = arith.constant 0 : index
    %c0_34 = arith.constant 0 : index
    %47 = vector.load %arg9[%c0_33, %c0_34] : memref<1x32xf32, #tpu.memory_space<vmem>>, vector<1x32xf32>
    %48 = vector.broadcast %47 : vector<1x32xf32> to vector<8x32xf32>
    %49 = arith.addf %46, %48 : vector<8x32xf32>
    %50 = arith.addf %1, %49 : vector<8x32xf32>
    %c0_35 = arith.constant 0 : index
    %c0_36 = arith.constant 0 : index
    %51 = vector.load %arg14[%c0_35, %c0_36] : memref<1x32xf32, #tpu.memory_space<vmem>>, vector<1x32xf32>
    %c0_37 = arith.constant 0 : index
    %c0_38 = arith.constant 0 : index
    %52 = vector.load %arg15[%c0_37, %c0_38] : memref<1x32xf32, #tpu.memory_space<vmem>>, vector<1x32xf32>
    %cst_39 = arith.constant dense<0.000000e+00> : vector<8xf32>
    %53 = vector.multi_reduction <add>, %50, %cst_39 [1] : vector<8x32xf32> to vector<8xf32>
    %54 = vector.shape_cast %53 : vector<8xf32> to vector<8x1xf32>
    %cst_40 = arith.constant 3.200000e+01 : f32
    %55 = vector.broadcast %cst_40 : f32 to vector<8x1xf32>
    %56 = arith.divf %54, %55 : vector<8x1xf32>
    %57 = vector.broadcast %56 : vector<8x1xf32> to vector<8x32xf32>
    %58 = arith.subf %50, %57 : vector<8x32xf32>
    %59 = arith.mulf %58, %58 : vector<8x32xf32>
    %cst_41 = arith.constant dense<0.000000e+00> : vector<8xf32>
    %60 = vector.multi_reduction <add>, %59, %cst_41 [1] : vector<8x32xf32> to vector<8xf32>
    %61 = vector.shape_cast %60 : vector<8xf32> to vector<8x1xf32>
    %cst_42 = arith.constant 3.200000e+01 : f32
    %62 = vector.broadcast %cst_42 : f32 to vector<8x1xf32>
    %63 = arith.divf %61, %62 : vector<8x1xf32>
    %64 = vector.broadcast %56 : vector<8x1xf32> to vector<8x32xf32>
    %65 = arith.subf %50, %64 : vector<8x32xf32>
    %cst_43 = arith.constant 9.99999974E-6 : f32
    %66 = vector.broadcast %cst_43 : f32 to vector<8x1xf32>
    %67 = arith.addf %63, %66 : vector<8x1xf32>
    %68 = math.rsqrt %67 : vector<8x1xf32>
    %69 = vector.broadcast %68 : vector<8x1xf32> to vector<8x32xf32>
    %70 = arith.mulf %65, %69 : vector<8x32xf32>
    %71 = vector.broadcast %51 : vector<1x32xf32> to vector<8x32xf32>
    %72 = arith.mulf %70, %71 : vector<8x32xf32>
    %73 = vector.broadcast %52 : vector<1x32xf32> to vector<8x32xf32>
    %74 = arith.addf %72, %73 : vector<8x32xf32>
    %75 = arith.truncf %74 : vector<8x32xf32> to vector<8x32xbf16>
    %c0_44 = arith.constant 0 : index
    %c0_45 = arith.constant 0 : index
    %76 = vector.load %arg10[%c0_44, %c0_45] : memref<32x64xbf16, #tpu.memory_space<vmem>>, vector<32x64xbf16>
    %cst_46 = arith.constant dense<0.000000e+00> : vector<8x64xf32>
    %77 = tpu.matmul %75, %76, %cst_46 {dimension_numbers = #tpu.dot_dimension_numbers<[1], [0], [0], [1], [0, 0, 1, 1], [], []>} : vector<8x32xbf16>, vector<32x64xbf16>, vector<8x64xf32> -> vector<8x64xf32>
    %c0_47 = arith.constant 0 : index
    %c0_48 = arith.constant 0 : index
    %78 = vector.load %arg11[%c0_47, %c0_48] : memref<1x64xf32, #tpu.memory_space<vmem>>, vector<1x64xf32>
    %79 = vector.broadcast %78 : vector<1x64xf32> to vector<8x64xf32>
    %80 = arith.addf %77, %79 : vector<8x64xf32>
    %cst_49 = arith.constant 0.000000e+00 : f32
    %81 = vector.broadcast %cst_49 : f32 to vector<8x64xf32>
    %82 = arith.maximumf %80, %81 : vector<8x64xf32>
    %83 = arith.truncf %82 : vector<8x64xf32> to vector<8x64xbf16>
    %c0_50 = arith.constant 0 : index
    %c0_51 = arith.constant 0 : index
    %84 = vector.load %arg12[%c0_50, %c0_51] : memref<64x32xbf16, #tpu.memory_space<vmem>>, vector<64x32xbf16>
    %cst_52 = arith.constant dense<0.000000e+00> : vector<8x32xf32>
    %85 = tpu.matmul %83, %84, %cst_52 {dimension_numbers = #tpu.dot_dimension_numbers<[1], [0], [0], [1], [0, 0, 1, 1], [], []>} : vector<8x64xbf16>, vector<64x32xbf16>, vector<8x32xf32> -> vector<8x32xf32>
    %c0_53 = arith.constant 0 : index
    %c0_54 = arith.constant 0 : index
    %86 = vector.load %arg13[%c0_53, %c0_54] : memref<1x32xf32, #tpu.memory_space<vmem>>, vector<1x32xf32>
    %87 = vector.broadcast %86 : vector<1x32xf32> to vector<8x32xf32>
    %88 = arith.addf %85, %87 : vector<8x32xf32>
    %89 = arith.addf %74, %88 : vector<8x32xf32>
    %c0_55 = arith.constant 0 : index
    %c0_56 = arith.constant 0 : index
    %90 = vector.load %arg16[%c0_55, %c0_56] : memref<1x32xf32, #tpu.memory_space<vmem>>, vector<1x32xf32>
    %c0_57 = arith.constant 0 : index
    %c0_58 = arith.constant 0 : index
    %91 = vector.load %arg17[%c0_57, %c0_58] : memref<1x32xf32, #tpu.memory_space<vmem>>, vector<1x32xf32>
    %cst_59 = arith.constant dense<0.000000e+00> : vector<8xf32>
    %92 = vector.multi_reduction <add>, %89, %cst_59 [1] : vector<8x32xf32> to vector<8xf32>
    %93 = vector.shape_cast %92 : vector<8xf32> to vector<8x1xf32>
    %cst_60 = arith.constant 3.200000e+01 : f32
    %94 = vector.broadcast %cst_60 : f32 to vector<8x1xf32>
    %95 = arith.divf %93, %94 : vector<8x1xf32>
    %96 = vector.broadcast %95 : vector<8x1xf32> to vector<8x32xf32>
    %97 = arith.subf %89, %96 : vector<8x32xf32>
    %98 = arith.mulf %97, %97 : vector<8x32xf32>
    %cst_61 = arith.constant dense<0.000000e+00> : vector<8xf32>
    %99 = vector.multi_reduction <add>, %98, %cst_61 [1] : vector<8x32xf32> to vector<8xf32>
    %100 = vector.shape_cast %99 : vector<8xf32> to vector<8x1xf32>
    %cst_62 = arith.constant 3.200000e+01 : f32
    %101 = vector.broadcast %cst_62 : f32 to vector<8x1xf32>
    %102 = arith.divf %100, %101 : vector<8x1xf32>
    %103 = vector.broadcast %95 : vector<8x1xf32> to vector<8x32xf32>
    %104 = arith.subf %89, %103 : vector<8x32xf32>
    %cst_63 = arith.constant 9.99999974E-6 : f32
    %105 = vector.broadcast %cst_63 : f32 to vector<8x1xf32>
    %106 = arith.addf %102, %105 : vector<8x1xf32>
    %107 = math.rsqrt %106 : vector<8x1xf32>
    %108 = vector.broadcast %107 : vector<8x1xf32> to vector<8x32xf32>
    %109 = arith.mulf %104, %108 : vector<8x32xf32>
    %110 = vector.broadcast %90 : vector<1x32xf32> to vector<8x32xf32>
    %111 = arith.mulf %109, %110 : vector<8x32xf32>
    %112 = vector.broadcast %91 : vector<1x32xf32> to vector<8x32xf32>
    %113 = arith.addf %111, %112 : vector<8x32xf32>
    %c0_64 = arith.constant 0 : index
    %c0_65 = arith.constant 0 : index
    %c0_66 = arith.constant 0 : index
    %114 = vector.load %arg18[%c0_64, %c0_65, %c0_66] : memref<1x8x32xf32, #tpu.memory_space<vmem>>, vector<1x8x32xf32>
    %115 = vector.shape_cast %114 : vector<1x8x32xf32> to vector<8x32xf32>
    %116 = vector.shape_cast %113 : vector<8x32xf32> to vector<1x8x32xf32>
    tpu.vector_store %arg18[%c0_64, %c0_65, %c0_66], %116 {strides = array<i32>} : memref<1x8x32xf32, #tpu.memory_space<vmem>>, vector<1x8x32xf32>,
    return
  }
  func.func @transform_0(%arg0: i32) -> (i32, i32, i32) {
    %c0_i32 = arith.constant 0 : i32
    %c0_i32_0 = arith.constant 0 : i32
    %c0_i32_1 = arith.constant 0 : i32
    return %arg0, %c0_i32, %c0_i32_0 : i32, i32, i32
  }
  func.func @transform_1(%arg0: i32) -> (i32, i32, i32) {
    %c0_i32 = arith.constant 0 : i32
    %c0_i32_0 = arith.constant 0 : i32
    %c0_i32_1 = arith.constant 0 : i32
    %c0_i32_2 = arith.constant 0 : i32
    return %c0_i32, %c0_i32_0, %c0_i32_1 : i32, i32, i32
  }
  func.func @transform_2(%arg0: i32) -> (i32, i32, i32) {
    %c0_i32 = arith.constant 0 : i32
    %c0_i32_0 = arith.constant 0 : i32
    %c0_i32_1 = arith.constant 0 : i32
    %c0_i32_2 = arith.constant 0 : i32
    return %c0_i32, %c0_i32_0, %c0_i32_1 : i32, i32, i32
  }
  func.func @transform_3(%arg0: i32) -> (i32, i32, i32) {
    %c0_i32 = arith.constant 0 : i32
    %c0_i32_0 = arith.constant 0 : i32
    %c0_i32_1 = arith.constant 0 : i32
    %c0_i32_2 = arith.constant 0 : i32
    return %c0_i32, %c0_i32_0, %c0_i32_1 : i32, i32, i32
  }
  func.func @transform_4(%arg0: i32) -> (i32, i32, i32) {
    %c0_i32 = arith.constant 0 : i32
    %c0_i32_0 = arith.constant 0 : i32
    %c0_i32_1 = arith.constant 0 : i32
    %c0_i32_2 = arith.constant 0 : i32
    return %c0_i32, %c0_i32_0, %c0_i32_1 : i32, i32, i32
  }
  func.func @transform_5(%arg0: i32) -> (i32, i32, i32) {
    %c0_i32 = arith.constant 0 : i32
    %c0_i32_0 = arith.constant 0 : i32
    %c0_i32_1 = arith.constant 0 : i32
    %c0_i32_2 = arith.constant 0 : i32
    return %c0_i32, %c0_i32_0, %c0_i32_1 : i32, i32, i32
  }
  func.func @transform_6(%arg0: i32) -> (i32, i32, i32) {
    %c0_i32 = arith.constant 0 : i32
    %c0_i32_0 = arith.constant 0 : i32
    %c0_i32_1 = arith.constant 0 : i32
    %c0_i32_2 = arith.constant 0 : i32
    return %c0_i32, %c0_i32_0, %c0_i32_1 : i32, i32, i32
  }
  func.func @transform_7(%arg0: i32) -> (i32, i32, i32) {
    %c0_i32 = arith.constant 0 : i32
    %c0_i32_0 = arith.constant 0 : i32
    %c0_i32_1 = arith.constant 0 : i32
    %c0_i32_2 = arith.constant 0 : i32
    return %c0_i32, %c0_i32_0, %c0_i32_1 : i32, i32, i32
  }
  func.func @transform_8(%arg0: i32) -> (i32, i32) {
    %c0_i32 = arith.constant 0 : i32
    %c0_i32_0 = arith.constant 0 : i32
    %c0_i32_1 = arith.constant 0 : i32
    return %c0_i32, %c0_i32_0 : i32, i32
  }
  func.func @transform_9(%arg0: i32) -> (i32, i32) {
    %c0_i32 = arith.constant 0 : i32
    %c0_i32_0 = arith.constant 0 : i32
    %c0_i32_1 = arith.constant 0 : i32
    return %c0_i32, %c0_i32_0 : i32, i32
  }
  func.func @transform_10(%arg0: i32) -> (i32, i32) {
    %c0_i32 = arith.constant 0 : i32
    %c0_i32_0 = arith.constant 0 : i32
    %c0_i32_1 = arith.constant 0 : i32
    return %c0_i32, %c0_i32_0 : i32, i32
  }
  func.func @transform_11(%arg0: i32) -> (i32, i32) {
    %c0_i32 = arith.constant 0 : i32
    %c0_i32_0 = arith.constant 0 : i32
    %c0_i32_1 = arith.constant 0 : i32
    return %c0_i32, %c0_i32_0 : i32, i32
  }
  func.func @transform_12(%arg0: i32) -> (i32, i32) {
    %c0_i32 = arith.constant 0 : i32
    %c0_i32_0 = arith.constant 0 : i32
    %c0_i32_1 = arith.constant 0 : i32
    return %c0_i32, %c0_i32_0 : i32, i32
  }
  func.func @transform_13(%arg0: i32) -> (i32, i32) {
    %c0_i32 = arith.constant 0 : i32
    %c0_i32_0 = arith.constant 0 : i32
    %c0_i32_1 = arith.constant 0 : i32
    return %c0_i32, %c0_i32_0 : i32, i32
  }
  func.func @transform_14(%arg0: i32) -> (i32, i32) {
    %c0_i32 = arith.constant 0 : i32
    %c0_i32_0 = arith.constant 0 : i32
    %c0_i32_1 = arith.constant 0 : i32
    return %c0_i32, %c0_i32_0 : i32, i32
  }
  func.func @transform_15(%arg0: i32) -> (i32, i32) {
    %c0_i32 = arith.constant 0 : i32
    %c0_i32_0 = arith.constant 0 : i32
    %c0_i32_1 = arith.constant 0 : i32
    return %c0_i32, %c0_i32_0 : i32, i32
  }
  func.func @transform_16(%arg0: i32) -> (i32, i32) {
    %c0_i32 = arith.constant 0 : i32
    %c0_i32_0 = arith.constant 0 : i32
    %c0_i32_1 = arith.constant 0 : i32
    return %c0_i32, %c0_i32_0 : i32, i32
  }
  func.func @transform_17(%arg0: i32) -> (i32, i32, i32) {
    %c0_i32 = arith.constant 0 : i32
    %c0_i32_0 = arith.constant 0 : i32
    %c0_i32_1 = arith.constant 0 : i32
    return %arg0, %c0_i32, %c0_i32_0 : i32, i32, i32
  }
}

</mosaic_0001>

<bundles_post_ra>
// kernel: transformer_forward.5
= control target key start
LH: loop header
LB: loop body
LE: loop exit
PB: predicated region body
PF: predicated region fallthrough
CT: control target
= control target key end

     0   :  { %vm38_vm0 = vcmask 261120   ;;  %s115_s1 = inlined_call_operand.vmem [shape: bf16[32,128], index: 1, kind: input, shape index: {}]   ;;  %s116_s0 = inlined_call_operand.vmem [shape: f32[16,32], index: 0, kind: input, shape index: {}]   ;;  %s117_s2 = inlined_call_operand.vmem [shape: f32[1,128], index: 2, kind: input, shape index: {}]   ;;  %s118_s3 = inlined_call_operand.vmem [shape: f32[16,128], index: 3, kind: output, shape index: {}]  }
   0x1   :  { %v72_v0 = vld [vmem:[%s115_s1 + $0x8] sm:$0xff]  ;;  %v71_v1 = vld [vmem:[%s115_s1] sm:$0xff] }
   0x2   :  { %48 = vmatpush.bf16.msra.mxu0 %v72_v0  ;;  %v15_v2 = vld [vmem:[%s116_s0] sm:$0xff]  ;;  %v16_v3 = vld [vmem:[%s116_s0 + $0x8] sm:$0xff] }
   0x3   :  { %v17_v4 = vpack.c.bf16 %v16_v3, %v15_v2  ;;  %v73_v5 = vld [vmem:[%s117_s2] ss:$0 sm:$0xff] }
   0x6   :  { %49 = vmatpush.bf16.msra.mxu0 %v71_v1 }
   0x9   :  { %70 = vmatmul.msk.bf16.vlgmr.msra.gmra.mxu0 %vm38_vm0, %v17_v4 }
  0x86   :  { %v51_v6 = vpop.f32.mrf.mxu0 }
  0x87   :  { %v52_v7 = vadd.f32 %v73_v5, %v51_v6 }
  0x89   :  { %56 = vst [vmem:[%s118_s3] sm:$0xff] %v52_v7 }
  0x8e   :  { %v53_v8 = vpop.f32.mrf.mxu0 }
  0x8f   :  { %v54_v9 = vadd.f32 %v73_v5, %v53_v8 }
  0x91   :  { %57 = vst [vmem:[%s118_s3 + $0x8] sm:$0xff] %v54_v9 }

// kernel: transformer_forward.3
= control target key start
LH: loop header
LB: loop body
LE: loop exit
PB: predicated region body
PF: predicated region fallthrough
CT: control target
= control target key end

     0   :  { %s1823_s24 = smov 0   ;;  %s2069_s0 = inlined_call_operand.vmem [shape: f32[2,8,32], index: 0, kind: input, shape index: {}]   ;;  %s2070_s1 = inlined_call_operand.vmem [shape: bf16[4,32,8], index: 1, kind: input, shape index: {}]   ;;  %s2071_s2 = inlined_call_operand.vmem [shape: bf16[4,32,8], index: 2, kind: input, shape index: {}]   ;;  %s2072_s3 = inlined_call_operand.vmem [shape: bf16[4,32,8], index: 3, kind: input, shape index: {}]   ;;  %s2073_s4 = inlined_call_operand.vmem [shape: f32[4,1,8], index: 4, kind: input, shape index: {}]   ;;  %s2074_s5 = inlined_call_operand.vmem [shape: f32[4,1,8], index: 5, kind: input, shape index: {}]   ;;  %s2075_s6 = inlined_call_operand.vmem [shape: f32[4,1,8], index: 6, kind: input, shape index: {}]   ;;  %s2076_s7 = inlined_call_operand.vmem [shape: bf16[4,8,32], index: 7, kind: input, shape index: {}]   ;;  %s2077_s8 = inlined_call_operand.vmem [shape: f32[1,32], index: 8, kind: input, shape index: {}]   ;;  %s2078_s9 = inlined_call_operand.vmem [shape: bf16[32,64], index: 9, kind: input, shape index: {}]   ;;  %s2079_s10 = inlined_call_operand.vmem [shape: f32[1,64], index: 10, kind: input, shape index: {}]   ;;  %s2080_s11 = inlined_call_operand.vmem [shape: bf16[64,32], index: 11, kind: input, shape index: {}]   ;;  %s2081_s12 = inlined_call_operand.vmem [shape: f32[1,32], index: 12, kind: input, shape index: {}]   ;;  %s2082_s13 = inlined_call_operand.vmem [shape: f32[1,32], index: 13, kind: input, shape index: {}]   ;;  %s2083_s14 = inlined_call_operand.vmem [shape: f32[1,32], index: 14, kind: input, shape index: {}]   ;;  %s2084_s15 = inlined_call_operand.vmem [shape: f32[1,32], index: 15, kind: input, shape index: {}]   ;;  %s2085_s16 = inlined_call_operand.vmem [shape: f32[1,32], index: 16, kind: input, shape index: {}]   ;;  %s2086_s17 = inlined_call_operand.vmem [shape: f32[2,8,32], index: 17, kind: output, shape index: {}]  }
   0x1   :  { %2089 = sst [smem:[#allocation3_spill]] %s2069_s0 }
   0x2   :  { %2090 = sst [smem:[#allocation4_spill]] %s2070_s1 }
   0x3 LB: > { %2091 = sst [smem:[#allocation2_spill]] %s1730_s24  ;;  %s1489_s25 = sadd.s32 4294967295, %s1730_s24   ;;  %s1730_s24 = sphi %s1823_s24, %s27_s24  }
   0x4   : > { %p1493_p0 = scmp.ge.s32.totalorder %s1730_s24, 1  ;;  %p486_p1 = scmp.lt.s32.totalorder %s1730_s24, 3 }
   0x6   : > { %p487_p2 = pnand %p1493_p0, %p486_p1 }
   0x7   : > { %s2092_s28 = sld [smem:[#allocation4_spill]] (!%p487_p2)  ;;  %p536_p3 = scmp.lt.s32.totalorder (!%p487_p2), %s1489_s25, 1 }
   0x8   : > { %490 = sbr.rel (%p487_p2) target bundleno = 1656 (0x678), region = 88  ;;  %s2093_s23 = sld [smem:[#allocation3_spill]] (!%p487_p2) }
   0xd   : > { %v1645_v0 = vld [vmem:[%s2092_s28 + $0x8] sm:$0xff]  ;;  %v1647_v1 = vld [vmem:[%s2092_s28 + $0x18] sm:$0xff]  ;;  %v1644_v4 = vld [vmem:[%s2092_s28] sm:$0xff]  ;;  %s2096_s25 = smov (!%p536_p3, %s1489_s25), 1  ;;  %vm591_vm0 = vcmask 261120   ;;  %vm955_vm1 = vcmask 64512  }
   0xe   : > { %v1649_v2 = vld [vmem:[%s2092_s28 + $0x28] sm:$0xff]  ;;  %v1651_v3 = vld [vmem:[%s2092_s28 + $0x38] sm:$0xff]  ;;  %601 = vmatpush.bf16.msra.mxu0 %v1645_v0  ;;  %626 = vmatpush.bf16.msra.mxu1 %v1647_v1  ;;  %v1646_v5 = vld [vmem:[%s2092_s28 + $0x10] sm:$0xff]  ;;  %s1494_s30 = sshll.u32 %s2096_s25, 3  ;;  %vm1100_vm2 = vcmask 1043456   ;;  %vm1385_vm8 = vcmask 523264  }
   0xf   : > { %651 = vmatpush.bf16.msra.mxu2 %v1649_v2  ;;  %676 = vmatpush.bf16.msra.mxu3 %v1651_v3  ;;  %v1648_v6 = vld [vmem:[%s2092_s28 + $0x20] sm:$0xff]  ;;  %v1650_v7 = vld [vmem:[%s2092_s28 + $0x30] sm:$0xff]  ;;  %v1653_v8 = vld [vmem:[%s2071_s2 + $0x8] sm:$0xff]  ;;  %s539_s24 = scalar_lea.vmem %s2093_s23, %s1494_s30  ;;  %s543_s18 = scalar_lea.vmem %s2086_s17, %s1494_s30 }
  0x10   : > { %v1655_v9 = vld [vmem:[%s2071_s2 + $0x18] sm:$0xff]  ;;  %v1657_v10 = vld [vmem:[%s2071_s2 + $0x28] sm:$0xff]  ;;  %v1875_v12 = vld [vmem:[%s539_s24] sm:$0xff] }
  0x11   : > { %v1659_v11 = vld [vmem:[%s2071_s2 + $0x38] sm:$0xff]  ;;  %v1652_v13 = vld [vmem:[%s2071_s2] sm:$0xff]  ;;  %v1654_v14 = vld [vmem:[%s2071_s2 + $0x10] sm:$0xff]  ;;  %v546_v15 = vpack.c.bf16 %v1875_v12, %v1875_v12 }
  0x12   : > { %602 = vmatpush.bf16.msra.mxu0 %v1644_v4  ;;  %627 = vmatpush.bf16.msra.mxu1 %v1646_v5  ;;  %v1656_v16 = vld [vmem:[%s2071_s2 + $0x20] sm:$0xff]  ;;  %v1658_v17 = vld [vmem:[%s2071_s2 + $0x30] sm:$0xff]  ;;  %v1665_v18 = vld [vmem:[%s2072_s3 + $0x28] sm:$0xff] }
  0x13   : > { %652 = vmatpush.bf16.msra.mxu2 %v1648_v6  ;;  %677 = vmatpush.bf16.msra.mxu3 %v1650_v7  ;;  %v1661_v19 = vld [vmem:[%s2072_s3 + $0x8] sm:$0xff]  ;;  %v1663_v20 = vld [vmem:[%s2072_s3 + $0x18] sm:$0xff]  ;;  %v1664_v21 = vld [vmem:[%s2072_s3 + $0x20] sm:$0xff] }
  0x14   : > { %v1660_v22 = vld [vmem:[%s2072_s3] sm:$0xff]  ;;  %v1662_v23 = vld [vmem:[%s2072_s3 + $0x10] sm:$0xff]  ;;  %v1667_v24 = vld [vmem:[%s2072_s3 + $0x38] sm:$0xff] }
  0x15   : > { %1504 = vmatmul.msk.bf16.vlgmr.msra.gmra.mxu0 %vm591_vm0, %v546_v15  ;;  %1513 = vmatmul.msk.bf16.vlgmr.msra.gmra.mxu1 %vm591_vm0, %v546_v15  ;;  %v1666_v25 = vld [vmem:[%s2072_s3 + $0x30] sm:$0xff]  ;;  %v1687_v32 = vld [vmem:[%s2074_s5] ss:$0 sm:$0xff]  ;;  %v1688_v33 = vld [vmem:[%s2074_s5 + $0x1] ss:$0 sm:$0xff] }
  0x16   : > { %733 = vmatpush.bf16.msrb.mxu0 %v1653_v8  ;;  %758 = vmatpush.bf16.msrb.mxu1 %v1655_v9  ;;  %v1684_v40 = vld [vmem:[%s2073_s4 + $0x1] ss:$0 sm:$0xff]  ;;  %v1683_v43 = vld [vmem:[%s2073_s4] ss:$0 sm:$0xff]  ;;  %v1689_v44 = vld [vmem:[%s2074_s5 + $0x2] ss:$0 sm:$0xff] }
  0x17   : > { %1522 = vmatmul.msk.bf16.vlgmr.msra.gmra.mxu2 %vm591_vm0, %v546_v15  ;;  %1531 = vmatmul.msk.bf16.vlgmr.msra.gmra.mxu3 %vm591_vm0, %v546_v15  ;;  %v1690_v45 = vld [vmem:[%s2074_s5 + $0x3] ss:$0 sm:$0xff]  ;;  %v1685_v57 = vld [vmem:[%s2073_s4 + $0x2] ss:$0 sm:$0xff]  ;;  %v1691_v6 = vld [vmem:[%s2075_s6] ss:$0 sm:$0xff] }
  0x18   : > { %783 = vmatpush.bf16.msrb.mxu2 %v1657_v10  ;;  %808 = vmatpush.bf16.msrb.mxu3 %v1659_v11  ;;  %v1686_v58 = vld [vmem:[%s2073_s4 + $0x3] ss:$0 sm:$0xff]  ;;  %v1692_v7 = vld [vmem:[%s2075_s6 + $0x1] ss:$0 sm:$0xff] }
  0x1a   : > { %734 = vmatpush.bf16.msrb.mxu0 %v1652_v13  ;;  %759 = vmatpush.bf16.msrb.mxu1 %v1654_v14  ;;  %v1693_v13 = vld [vmem:[%s2075_s6 + $0x2] ss:$0 sm:$0xff] }
  0x1c   : > { %784 = vmatpush.bf16.msrb.mxu2 %v1656_v16  ;;  %809 = vmatpush.bf16.msrb.mxu3 %v1658_v17 }
  0x1e   : > { %865 = vmatpush.bf16.msra.mxu0 %v1661_v19  ;;  %890 = vmatpush.bf16.msra.mxu1 %v1663_v20 }
  0x20   : > { %915 = vmatpush.bf16.msra.mxu2 %v1665_v18  ;;  %940 = vmatpush.bf16.msra.mxu3 %v1667_v24  ;;  %v1694_v24 = vld [vmem:[%s2075_s6 + $0x3] ss:$0 sm:$0xff] }
  0x22   : > { %866 = vmatpush.bf16.msra.mxu0 %v1660_v22  ;;  %891 = vmatpush.bf16.msra.mxu1 %v1662_v23 }
  0x24   : > { %916 = vmatpush.bf16.msra.mxu2 %v1664_v21  ;;  %941 = vmatpush.bf16.msra.mxu3 %v1666_v25 }
  0x25   : > { %1540 = vmatmul.msk.bf16.vlgmr.msrb.gmra.mxu0 %vm591_vm0, %v546_v15  ;;  %1549 = vmatmul.msk.bf16.vlgmr.msrb.gmra.mxu1 %vm591_vm0, %v546_v15 }
  0x27   : > { %1558 = vmatmul.msk.bf16.vlgmr.msrb.gmra.mxu2 %vm591_vm0, %v546_v15  ;;  %1567 = vmatmul.msk.bf16.vlgmr.msrb.gmra.mxu3 %vm591_vm0, %v546_v15 }
  0x35   : > { %1576 = vmatmul.msk.bf16.vlgmr.msra.gmra.mxu0 %vm591_vm0, %v546_v15  ;;  %1585 = vmatmul.msk.bf16.vlgmr.msra.gmra.mxu1 %vm591_vm0, %v546_v15 }
  0x37   : > { %1594 = vmatmul.msk.bf16.vlgmr.msra.gmra.mxu2 %vm591_vm0, %v546_v15  ;;  %1603 = vmatmul.msk.bf16.vlgmr.msra.gmra.mxu3 %vm591_vm0, %v546_v15 }
  0x92   : > { %v604_v26 = vpop.f32.mrf.mxu0  ;;  %v629_v27 = vpop.f32.mrf.mxu1 }
  0x93   : > { %v630_v48 = vadd.f32 %v1684_v40, %v629_v27  ;;  %v605_v51 = vadd.f32 %v1683_v43, %v604_v26 }
  0x95   : > { %v948_v56 = vpack.c.bf16 %v630_v48, %v630_v48  ;;  %v947_v61 = vpack.c.bf16 %v605_v51, %v605_v51 }
  0x9a   : > { %v654_v28 = vpop.f32.mrf.mxu2  ;;  %v679_v29 = vpop.f32.mrf.mxu3 }
  0x9b   : > { %v606_v30 = vpop.f32.mrf.mxu0  ;;  %v631_v31 = vpop.f32.mrf.mxu1  ;;  %v655_v0 = vadd.f32 %v1685_v57, %v654_v28  ;;  %v680_v1 = vadd.f32 %v1686_v58, %v679_v29 }
  0x9c   : > { %v1036_v31 = vlaneseq }
  0x9d   : > { %v949_v4 = vpack.c.bf16 %v655_v0, %v655_v0  ;;  %v950_v5 = vpack.c.bf16 %v680_v1, %v680_v1 }
  0xa2   : > { %v656_v34 = vpop.f32.mrf.mxu2  ;;  %v681_v35 = vpop.f32.mrf.mxu3 }
  0xa3   : > { %v736_v36 = vpop.f32.mrf.mxu0  ;;  %v761_v37 = vpop.f32.mrf.mxu1 }
  0xa4   : > { %v737_v38 = vadd.f32 %v1687_v32, %v736_v36  ;;  %v762_v39 = vadd.f32 %v1688_v33, %v761_v37  ;;  %v1037_v32 = vshrl.u32 %v1036_v31, 7  ;;  %v1039_v33 = vand.u32 127, %v1036_v31  ;;  %v1180_v31 = vld [vmem:[%s2076_s7 + $0x8] sm:$0xf] }
  0xa6   : > { %v951_v41 = vpack.c.bf16 %v737_v38, %v737_v38  ;;  %v952_v42 = vpack.c.bf16 %v762_v39, %v762_v39  ;;  %vm1040_vm3 = vcmp.le.s32.totalorder %v1039_v33, %v1037_v32  ;;  %v1224_v32 = vsel %vm1100_vm2, %v1180_v31, 0  ;;  %v1181_v33 = vld [vmem:[%s2076_s7 + $0xc] sm:$0xf] }
  0xa8   : > { %v960_v46 = vsel %vm955_vm1, %v951_v41, 0  ;;  %v979_v47 = vsel %vm955_vm1, %v952_v42, 0 }
  0xa9   : > { %969 = vmatpush.bf16.xpose.msrb.mxu0 %v960_v46  ;;  %988 = vmatpush.bf16.xpose.msrb.mxu1 %v979_v47 }
  0xaa   : > { %v786_v49 = vpop.f32.mrf.mxu2  ;;  %v811_v50 = vpop.f32.mrf.mxu3 }
  0xab   : > { %v787_v52 = vadd.f32 %v1689_v44, %v786_v49  ;;  %v812_v53 = vadd.f32 %v1690_v45, %v811_v50  ;;  %v738_v54 = vpop.f32.mrf.mxu0  ;;  %v763_v55 = vpop.f32.mrf.mxu1 }
  0xad   : > { %v953_v59 = vpack.c.bf16 %v787_v52, %v787_v52  ;;  %v954_v60 = vpack.c.bf16 %v812_v53, %v812_v53 }
  0xaf   : > { %v998_v62 = vsel %vm955_vm1, %v953_v59, 0  ;;  %v1017_v63 = vsel %vm955_vm1, %v954_v60, 0 }
  0xb0   : > { %1007 = vmatpush.bf16.xpose.msrb.mxu2 %v998_v62  ;;  %1026 = vmatpush.bf16.xpose.msrb.mxu3 %v1017_v63 }
  0xb1   : > { %1604 = vmatmul.msk.bf16.vlgmr.msrb.gmra.mxu0 %vm955_vm1, %v947_v61  ;;  %1605 = vmatmul.msk.bf16.vlgmr.msrb.gmra.mxu1 %vm955_vm1, %v948_v56 }
  0xb2   : > { %v788_v2 = vpop.f32.mrf.mxu2  ;;  %v813_v3 = vpop.f32.mrf.mxu3 }
  0xb3   : > { %v868_v8 = vpop.f32.mrf.mxu0  ;;  %v893_v9 = vpop.f32.mrf.mxu1 }
  0xb4   : > { %v869_v10 = vadd.f32 %v1691_v6, %v868_v8  ;;  %v894_v11 = vadd.f32 %v1692_v7, %v893_v9 }
  0xb6   : > { %v1093_v14 = vpack.c.bf16 %v869_v10, %v869_v10  ;;  %v1094_v15 = vpack.c.bf16 %v894_v11, %v894_v11 }
  0xb7   : > { %1606 = vmatmul.msk.bf16.vlgmr.msrb.gmra.mxu2 %vm955_vm1, %v949_v4  ;;  %1607 = vmatmul.msk.bf16.vlgmr.msrb.gmra.mxu3 %vm955_vm1, %v950_v5 }
  0xb8   : > { %v1102_v17 = vsel %vm1100_vm2, %v1093_v14, 0  ;;  %v1121_v18 = vsel %vm1100_vm2, %v1094_v15, 0 }
  0xb9   : > { %1111 = vmatpush.bf16.msra.mxu0 %v1102_v17  ;;  %1130 = vmatpush.bf16.msra.mxu1 %v1121_v18 }
  0xba   : > { %v918_v16 = vpop.f32.mrf.mxu2  ;;  %v943_v25 = vpop.f32.mrf.mxu3 }
  0xbb   : > { %v919_v19 = vadd.f32 %v1693_v13, %v918_v16  ;;  %v870_v21 = vpop.f32.mrf.mxu0  ;;  %v895_v22 = vpop.f32.mrf.mxu1  ;;  %v944_v27 = vadd.f32 %v1694_v24, %v943_v25 }
  0xbd   : > { %v1095_v20 = vpack.c.bf16 %v919_v19, %v919_v19  ;;  %v1096_v28 = vpack.c.bf16 %v944_v27, %v944_v27  ;;  %v1178_v27 = vld [vmem:[%s2076_s7] sm:$0xf] }
  0xbf   : > { %v1140_v23 = vsel %vm1100_vm2, %v1095_v20, 0  ;;  %v1159_v29 = vsel %vm1100_vm2, %v1096_v28, 0  ;;  %v1186_v28 = vsel %vm1100_vm2, %v1178_v27, 0  ;;  %v1696_v27 = vld [vmem:[%s2082_s13] ss:$0 sm:$0xff] }
  0xc0   : > { %1149 = vmatpush.bf16.msra.mxu2 %v1140_v23  ;;  %1168 = vmatpush.bf16.msra.mxu3 %v1159_v29  ;;  %v1179_v29 = vld [vmem:[%s2076_s7 + $0x4] sm:$0xf] }
  0xc1   : > { %1195 = vmatpush.bf16.msrb.mxu0 %v1186_v28 }
  0xc2   : > { %v920_v26 = vpop.f32.mrf.mxu2  ;;  %v945_v30 = vpop.f32.mrf.mxu3 }
  0xc3   : > { %v1205_v30 = vsel %vm1100_vm2, %v1179_v29, 0  ;;  %v1697_v29 = vld [vmem:[%s2083_s14] ss:$0 sm:$0xff] }
  0xc4   : > { %1214 = vmatpush.bf16.msrb.mxu1 %v1205_v30  ;;  %1233 = vmatpush.bf16.msrb.mxu2 %v1224_v32 }
 0x12e   : > { %v971_v34 = vpop.f32.mrf.mxu0  ;;  %v990_v35 = vpop.f32.mrf.mxu1 }
 0x12f   : > { %v1032_v36 = vmul.f32 0.35355338, %v971_v34  ;;  %v1033_v39 = vmul.f32 0.35355338, %v990_v35  ;;  %v1243_v34 = vsel %vm1100_vm2, %v1181_v33, 0 }
 0x130   : > { %1252 = vmatpush.bf16.msrb.mxu3 %v1243_v34  ;;  %v1671_v34 = vld [vmem:[%s2080_s11 + $0x8] sm:$0xff] }
 0x131   : > { %v1041_v37 = vsel %vm1040_vm3, %v1032_v36, -1e+30  ;;  %v1042_v42 = vsel %vm1040_vm3, %v1033_v39, -1e+30 }
 0x132   : > { %v1045_v38 = vsel %vm955_vm1, %v1041_v37, -inf  ;;  %v1048_v45 = vsel %vm955_vm1, %v1042_v42, -inf }
 0x133   : > { %1046 = vmax.xlane.f32.xlu1 %v1045_v38 }
 0x136   : > { %v973_v40 = vpop.f32.mrf.mxu0  ;;  %v992_v41 = vpop.f32.mrf.mxu1 }
 0x13a   : > { %v1009_v43 = vpop.f32.mrf.mxu2  ;;  %v1028_v44 = vpop.f32.mrf.mxu3 }
 0x13b   : > { %v1034_v46 = vmul.f32 0.35355338, %v1009_v43  ;;  %1049 = vmax.xlane.f32.xlu1 %v1048_v45  ;;  %v1035_v49 = vmul.f32 0.35355338, %v1028_v44 }
 0x13d   : > { %v1043_v47 = vsel %vm1040_vm3, %v1034_v46, -1e+30  ;;  %v1044_v52 = vsel %vm1040_vm3, %v1035_v49, -1e+30 }
 0x13e   : > { %v1051_v48 = vsel %vm955_vm1, %v1043_v47, -inf  ;;  %v1054_v53 = vsel %vm955_vm1, %v1044_v52, -inf }
 0x13f   : > { %1052 = vmax.xlane.f32.xlu0 %v1051_v48 }
 0x142   : > { %v1011_v50 = vpop.f32.mrf.mxu2  ;;  %v1030_v51 = vpop.f32.mrf.mxu3 }
 0x147   : > { %1055 = vmax.xlane.f32.xlu0 %v1054_v53 }
 0x1a6   : > { %v1047_v54 = vpop.xlane.xlu1 %1046 }
 0x1a7   : > { %v1057_v55 = vsub.f32 %v1041_v37, %v1047_v54 }
 0x1a9   : > { %v1061_v56 = vmul.f32 1.442695, %v1057_v55 }
 0x1ab   : > { %1702 = vpow2.f32 %v1061_v56 }
 0x1ae   : > { %v1050_v57 = vpop.xlane.xlu1 %1049 }
 0x1af   : > { %v1058_v58 = vsub.f32 %v1042_v42, %v1050_v57 }
 0x1b1   : > { %v1703_v59 = vpop.eup %1702  ;;  %v1063_v60 = vmul.f32 1.442695, %v1058_v58 }
 0x1b2   : > { %v1053_v61 = vpop.xlane.xlu0 %1052  ;;  %v1069_v62 = vsel %vm955_vm1, %v1703_v59, 0.0 }
 0x1b3   : > { %1704 = vpow2.f32 %v1063_v60  ;;  %v1059_v63 = vsub.f32 %v1043_v47, %v1053_v61  ;;  %1070 = vadd.xlane.f32.xlu0 %v1069_v62 }
 0x1b5   : > { %v1065_v0 = vmul.f32 1.442695, %v1059_v63 }
 0x1b7   : > { %1706 = vpow2.f32 %v1065_v0 }
 0x1b9   : > { %v1705_v1 = vpop.eup %1704 }
 0x1ba   : > { %v1056_v2 = vpop.xlane.xlu0 %1055  ;;  %v1072_v3 = vsel %vm955_vm1, %v1705_v1, 0.0 }
 0x1bb   : > { %v1060_v4 = vsub.f32 %v1044_v52, %v1056_v2  ;;  %1073 = vadd.xlane.f32.xlu1 %v1072_v3  ;;  %v1732_v2 = vmov 32.0  }
 0x1bd   : > { %v1707_v5 = vpop.eup %1706  ;;  %v1067_v6 = vmul.f32 1.442695, %v1060_v4 }
 0x1be   : > { %v1075_v7 = vsel %vm955_vm1, %v1707_v5, 0.0 }
 0x1bf   : > { %1708 = vpow2.f32 %v1067_v6  ;;  %1076 = vadd.xlane.f32.xlu2 %v1075_v7 }
 0x1c5   : > { %v1709_v8 = vpop.eup %1708 }
 0x1c6   : > { %v1078_v9 = vsel %vm955_vm1, %v1709_v8, 0.0 }
 0x1c7   : > { %1079 = vadd.xlane.f32.xlu2 %v1078_v9 }
 0x226   : > { %v1071_v10 = vpop.xlane.xlu0 %1070 }
 0x227   : > { %1710 = vrcp.f32 %v1071_v10 }
 0x22d   : > { %v1711_v11 = vpop.eup %1710 }
 0x22e   : > { %v1085_v13 = vmul.f32 %v1711_v11, %v1703_v59  ;;  %v1074_v14 = vpop.xlane.xlu1 %1073  ;;  %v1695_v59 = vld [vmem:[%s2077_s8] ss:$0 sm:$0xff] }
 0x22f   : > { %1712 = vrcp.f32 %v1074_v14 }
 0x230   : > { %v1089_v15 = vpack.c.bf16 %v1085_v13, %v1085_v13 }
 0x232   : > { %v1077_v16 = vpop.xlane.xlu2 %1076  ;;  %1608 = vmatmul.msk.bf16.vlgmr.msra.gmra.mxu0 %vm955_vm1, %v1089_v15  ;;  %v1668_v15 = vld [vmem:[%s2078_s9] sm:$0xff] }
 0x233   : > { %1714 = vrcp.f32 %v1077_v16  ;;  %v1673_v16 = vld [vmem:[%s2080_s11 + $0x18] sm:$0xff] }
 0x235   : > { %v1713_v17 = vpop.eup %1712 }
 0x236   : > { %v1086_v18 = vmul.f32 %v1713_v17, %v1705_v1 }
 0x238   : > { %v1090_v19 = vpack.c.bf16 %v1086_v18, %v1086_v18 }
 0x239   : > { %v1715_v20 = vpop.eup %1714 }
 0x23a   : > { %v1087_v21 = vmul.f32 %v1715_v20, %v1707_v5  ;;  %v1080_v22 = vpop.xlane.xlu2 %1079  ;;  %1609 = vmatmul.msk.bf16.vlgmr.msra.gmra.mxu1 %vm955_vm1, %v1090_v19  ;;  %v1672_v19 = vld [vmem:[%s2080_s11 + $0x10] sm:$0xff] }
 0x23b   : > { %1716 = vrcp.f32 %v1080_v22  ;;  %1393 = vmatpush.bf16.msra.mxu1 %v1673_v16 }
 0x23c   : > { %v1091_v23 = vpack.c.bf16 %v1087_v21, %v1087_v21  ;;  %1718 = vrcp.f32 %v1732_v2 }
 0x23e   : > { %1610 = vmatmul.msk.bf16.vlgmr.msra.gmra.mxu2 %vm955_vm1, %v1091_v23 }
 0x23f   : > { %1394 = vmatpush.bf16.msra.mxu1 %v1672_v19 }
 0x241   : > { %v1717_v24 = vpop.eup %1716 }
 0x242   : > { %v1088_v25 = vmul.f32 %v1717_v24, %v1709_v8  ;;  %v1719_v3 = vpop.eup %1718 }
 0x243   : > { %v1277_v4 = vmul.f32 32.0, %v1719_v3  ;;  %vm1281_vm4 = vweird.f32 %v1719_v3  ;;  %1395 = vmatpush.bf16.msra.mxu1 %v1671_v34 }
 0x244   : > { %v1092_v26 = vpack.c.bf16 %v1088_v25, %v1088_v25 }
 0x245   : > { %v1278_v5 = vsub.f32 1.0, %v1277_v4 }
 0x246   : > { %1611 = vmatmul.msk.bf16.vlgmr.msra.gmra.mxu3 %vm955_vm1, %v1092_v26 }
 0x247   : > { %v1279_v6 = vmul.f32 %v1719_v3, %v1278_v5 }
 0x249   : > { %v1280_v7 = vadd.f32 %v1719_v3, %v1279_v6 }
 0x24b   : > { %v1282_v8 = vsel %vm1281_vm4, %v1719_v3, %v1280_v7 }
 0x2af   : > { %v1113_v35 = vpop.f32.mrf.mxu0 }
 0x2b0   : > { %v1174_v36 = vpack.c.bf16 %v1113_v35, %v1113_v35  ;;  %v1670_v35 = vld [vmem:[%s2080_s11] sm:$0xff] }
 0x2b1   : > { %1396 = vmatpush.bf16.msra.mxu1 %v1670_v35 }
 0x2b2   : > { %1612 = vmatmul.msk.bf16.vlgmr.msrb.gmra.mxu0 %vm955_vm1, %v1174_v36  ;;  %v1698_v36 = vld [vmem:[%s2079_s10] ss:$0 sm:$0xff] }
 0x2b7   : > { %v1115_v37 = vpop.f32.mrf.mxu0  ;;  %v1132_v38 = vpop.f32.mrf.mxu1 }
 0x2b8   : > { %v1175_v39 = vpack.c.bf16 %v1132_v38, %v1132_v38 }
 0x2ba   : > { %1613 = vmatmul.msk.bf16.vlgmr.msrb.gmra.mxu1 %vm955_vm1, %v1175_v39 }
 0x2bf   : > { %v1134_v40 = vpop.f32.mrf.mxu1 }
 0x2c1   : > { %v1151_v41 = vpop.f32.mrf.mxu2 }
 0x2c2   : > { %v1176_v42 = vpack.c.bf16 %v1151_v41, %v1151_v41 }
 0x2c4   : > { %1614 = vmatmul.msk.bf16.vlgmr.msrb.gmra.mxu2 %vm955_vm1, %v1176_v42  ;;  %v1699_v42 = vld [vmem:[%s2081_s12] ss:$0 sm:$0xff] }
 0x2c9   : > { %v1153_v43 = vpop.f32.mrf.mxu2  ;;  %v1170_v44 = vpop.f32.mrf.mxu3 }
 0x2ca   : > { %v1177_v45 = vpack.c.bf16 %v1170_v44, %v1170_v44 }
 0x2cc   : > { %1615 = vmatmul.msk.bf16.vlgmr.msrb.gmra.mxu3 %vm955_vm1, %v1177_v45 }
 0x2d1   : > { %v1172_v46 = vpop.f32.mrf.mxu3 }
 0x32f   : > { %v1197_v47 = vpop.f32.mrf.mxu0 }
 0x330   : > { %v1258_v53 = vsel %vm591_vm0, %v1197_v47, 0.0 }
 0x337   : > { %v1199_v48 = vpop.f32.mrf.mxu0  ;;  %v1216_v49 = vpop.f32.mrf.mxu1 }
 0x338   : > { %v1259_v52 = vsel %vm591_vm0, %v1216_v49, 0.0 }
 0x339   : > { %v1260_v55 = vadd.f32 %v1259_v52, %v1258_v53 }
 0x33f   : > { %v1218_v50 = vpop.f32.mrf.mxu1 }
 0x347   : > { %v1235_v51 = vpop.f32.mrf.mxu2 }
 0x348   : > { %v1261_v54 = vsel %vm591_vm0, %v1235_v51, 0.0 }
 0x349   : > { %v1262_v56 = vadd.f32 %v1261_v54, %v1260_v55 }
 0x34f   : > { %v1237_v57 = vpop.f32.mrf.mxu2  ;;  %v1254_v58 = vpop.f32.mrf.mxu3 }
 0x350   : > { %v1263_v60 = vsel %vm591_vm0, %v1254_v58, 0.0 }
 0x351   : > { %v1264_v61 = vadd.f32 %v1263_v60, %v1262_v56 }
 0x353   : > { %v1269_v62 = vadd.f32 %v1695_v59, %v1264_v61 }
 0x355   : > { %v1270_v63 = vadd.f32 %v1269_v62, %v1875_v12  ;;  %v1669_v12 = vld [vmem:[%s2078_s9 + $0x8] sm:$0xff]  ;;  %v1700_v62 = vld [vmem:[%s2084_s15] ss:$0 sm:$0xff] }
 0x356   : > { %1340 = vmatpush.bf16.msra.mxu0 %v1669_v12 }
 0x357   : > { %v1256_v0 = vpop.f32.mrf.mxu3  ;;  %v1273_v1 = vsel %vm591_vm0, %v1270_v63, 0.0 }
 0x358   : > { %1274 = vadd.xlane.f32.xlu2 %v1273_v1  ;;  %v1701_v0 = vld [vmem:[%s2085_s16] ss:$0 sm:$0xff] }
 0x35a   : > { %1341 = vmatpush.bf16.msra.mxu0 %v1668_v15 }
 0x3cb   : > { %v1275_v9 = vpop.xlane.xlu2 %1274 }
 0x3cc   : > { %v1283_v10 = vmul.f32 %v1282_v8, %v1275_v9 }
 0x3ce   : > { %v1284_v11 = vsub.f32 %v1270_v63, %v1283_v10 }
 0x3d0   : > { %v1285_v13 = vmul.f32 %v1284_v11, %v1284_v11 }
 0x3d2   : > { %v1286_v14 = vsel %vm591_vm0, %v1285_v13, 0.0 }
 0x3d3   : > { %1287 = vadd.xlane.f32.xlu0 %v1286_v14 }
 0x446   : > { %v1288_v17 = vpop.xlane.xlu0 %1287 }
 0x447   : > { %v1289_v18 = vmul.f32 %v1288_v17, %v1282_v8 }
 0x449   : > { %v1290_v20 = vadd.f32 1e-05, %v1289_v18 }
 0x44b   : > { %1720 = vrsqrt.f32 %v1290_v20  ;;  %vm1297_vm6 = vweird.f32 %v1290_v20 }
 0x451   : > { %v1721_v21 = vpop.eup %1720 }
 0x452   : > { %v1292_v22 = vmul.f32 %v1721_v21, %v1290_v20  ;;  %vm1298_vm5 = vweird.f32 %v1721_v21 }
 0x453   : > { %vm1299_vm7 = vmor %vm1297_vm6, %vm1298_vm5 }
 0x454   : > { %v1293_v23 = vmul.f32 %v1721_v21, %v1292_v22 }
 0x456   : > { %v1294_v24 = vmul.f32 0.5, %v1293_v23 }
 0x458   : > { %v1295_v25 = vsub.f32 1.5, %v1294_v24 }
 0x45a   : > { %v1296_v26 = vmul.f32 %v1721_v21, %v1295_v25 }
 0x45c   : > { %v1300_v28 = vsel %vm1299_vm7, %v1721_v21, %v1296_v26 }
 0x45d   : > { %v1301_v30 = vmul.f32 %v1300_v28, %v1284_v11 }
 0x45f   : > { %v1305_v31 = vmul.f32 %v1696_v27, %v1301_v30 }
 0x461   : > { %v1309_v32 = vadd.f32 %v1697_v29, %v1305_v31 }
 0x463   : > { %v1310_v33 = vpack.c.bf16 %v1309_v32, %v1309_v32 }
 0x465   : > { %1624 = vmatmul.msk.bf16.vlgmr.msra.gmra.mxu0 %vm591_vm0, %v1310_v33 }
 0x4e2   : > { %v1343_v37 = vpop.f32.mrf.mxu0 }
 0x4e3   : > { %v1344_v38 = vadd.f32 %v1698_v36, %v1343_v37 }
 0x4e5   : > { %v1347_v39 = vmax.f32 %v1344_v38, 0.0 }
 0x4e7   : > { %v1348_v40 = vpack.c.bf16 %v1347_v39, %v1347_v39 }
 0x4e9   : > { %1641 = vmatmul.msk.bf16.vlgmr.msra.gmra.mxu1 %vm1385_vm8, %v1348_v40 }
 0x4ea   : > { %v1345_v41 = vpop.f32.mrf.mxu0 }
 0x566   : > { %v1398_v43 = vpop.f32.mrf.mxu1 }
 0x567   : > { %v1399_v44 = vadd.f32 %v1699_v42, %v1398_v43 }
 0x569   : > { %v1402_v45 = vadd.f32 %v1399_v44, %v1309_v32 }
 0x56b   : > { %v1405_v46 = vsel %vm591_vm0, %v1402_v45, 0.0 }
 0x56c   : > { %1406 = vadd.xlane.f32.xlu1 %v1405_v46 }
 0x56e   : > { %v1400_v47 = vpop.f32.mrf.mxu1 }
 0x5df   : > { %v1407_v48 = vpop.xlane.xlu1 %1406 }
 0x5e0   : > { %v1408_v49 = vmul.f32 %v1407_v48, %v1282_v8 }
 0x5e2   : > { %v1409_v50 = vsub.f32 %v1402_v45, %v1408_v49 }
 0x5e4   : > { %v1410_v51 = vmul.f32 %v1409_v50, %v1409_v50 }
 0x5e6   : > { %v1411_v52 = vsel %vm591_vm0, %v1410_v51, 0.0 }
 0x5e7   : > { %1412 = vadd.xlane.f32.xlu2 %v1411_v52 }
 0x65a   : > { %v1413_v53 = vpop.xlane.xlu2 %1412 }
 0x65b   : > { %v1414_v54 = vmul.f32 %v1413_v53, %v1282_v8 }
 0x65d   : > { %v1415_v55 = vadd.f32 1e-05, %v1414_v54 }
 0x65f   : > { %1722 = vrsqrt.f32 %v1415_v55  ;;  %vm1422_vm10 = vweird.f32 %v1415_v55 }
 0x665   : > { %v1723_v56 = vpop.eup %1722 }
 0x666   : > { %v1417_v57 = vmul.f32 %v1723_v56, %v1415_v55  ;;  %vm1423_vm9 = vweird.f32 %v1723_v56 }
 0x667   : > { %vm1424_vm11 = vmor %vm1422_vm10, %vm1423_vm9 }
 0x668   : > { %v1418_v58 = vmul.f32 %v1723_v56, %v1417_v57 }
 0x66a   : > { %v1419_v59 = vmul.f32 0.5, %v1418_v58 }
 0x66c   : > { %v1420_v60 = vsub.f32 1.5, %v1419_v59 }
 0x66e   : > { %v1421_v61 = vmul.f32 %v1723_v56, %v1420_v60 }
 0x670   : > { %v1425_v63 = vsel %vm1424_vm11, %v1723_v56, %v1421_v61 }
 0x671   : > { %v1426_v1 = vmul.f32 %v1425_v63, %v1409_v50 }
 0x673   : > { %v1430_v2 = vmul.f32 %v1700_v62, %v1426_v1 }
 0x675   : > { %v1434_v3 = vadd.f32 %v1701_v0, %v1430_v2 }
 0x677   : > { %1435 = vst.msk [vmem:[%s543_s18] sm:$0xff] %vm591_vm0, %v1434_v3 }
 0x678 PF: > { %s2094_s19 = sld [smem:[#allocation2_spill]] }
 0x67e   : > { %s27_s24 = sadd.s32 1, %s2094_s19  }
 0x67f   : > { %p24_p4 = scmp.ge.s32.totalorder %s27_s24, 4  }
 0x681   :  { %26 = sbr.rel (!%p24_p4) target bundleno = 3 (0x3), region = 118 }

</bundles_post_ra>
